<compile_context>
chip_gen: v5e
topology: v5e:2x2
jax: 0.10.0
libtpu: 0.0.40
codegen_flags: <defaults>
</compile_context>

<pallas_src>
import math

import numpy as np
import jax
import jax.numpy as jnp
from jax.experimental import pallas as pl
from jax.experimental.pallas import tpu as pltpu


# ----------------------------------------------------------------------------
# Generic linear kernel (used for value_proj): M-tiled, bf16 MXU operands.
# ----------------------------------------------------------------------------
def _linear_kernel(x_ref, w_ref, b_ref, o_ref):
    acc = jnp.dot(x_ref[...].astype(jnp.bfloat16), w_ref[...],
                  preferred_element_type=jnp.float32) + b_ref[...]
    o_ref[...] = acc.astype(o_ref.dtype)


def _pick_block_m(M, target=128):
    """Largest divisor of M that is a multiple of 8 and <= target (else M)."""
    if M <= target:
        return M
    for bm in range(target, 7, -1):
        if M % bm == 0 and bm % 8 == 0:
            return bm
    return M


def pallas_linear(x, w, b, out_dtype=jnp.float32, block_m=128):
    """x: (M, K) @ w: (K, N) + b: (N,) -> (M, N)."""
    M, K = x.shape
    N = w.shape[1]
    bm = _pick_block_m(M, block_m)
    return pl.pallas_call(
        _linear_kernel,
        grid=(M // bm,),
        in_specs=[pl.BlockSpec((bm, K), lambda i: (i, 0)),
                  pl.BlockSpec((K, N), lambda i: (0, 0)),
                  pl.BlockSpec((1, N), lambda i: (0, 0))],
        out_specs=pl.BlockSpec((bm, N), lambda i: (i, 0)),
        out_shape=jax.ShapeDtypeStruct((M, N), out_dtype),
        compiler_params=pltpu.CompilerParams(
            dimension_semantics=("parallel",)),
    )(x.astype(jnp.float32), w.astype(jnp.bfloat16),
      b.reshape(1, N).astype(jnp.float32))


# ----------------------------------------------------------------------------
# Fused query-side projections + (curr|temporal) softmax epilogue.
# Output columns: [curr_off | temp_off | curr_attw(softmaxed) | temp_attw(softmaxed) | 0-pad]
# padded to a multiple of 128 so the single store is lane-dense.
# ----------------------------------------------------------------------------
def _make_fused_proj_kernel(H, LPc, TLPt, off_cl, off_tl, n_raw, n_pad):
    def kernel(x_ref, w_ref, b_ref, o_ref):
        y = jnp.dot(x_ref[...].astype(jnp.bfloat16), w_ref[...],
                    preferred_element_type=jnp.float32) + b_ref[...]
        pieces = [y[:, :off_cl]]                      # offsets pass through
        curr_sm, temp_sm = [], []
        for h in range(H):                            # per-head softmax over 12 logits
            c = y[:, off_cl + h * LPc: off_cl + (h + 1) * LPc]
            t = y[:, off_tl + h * TLPt: off_tl + (h + 1) * TLPt]
            m = jnp.maximum(jnp.max(c, axis=-1, keepdims=True),
                            jnp.max(t, axis=-1, keepdims=True))
            ec = jnp.exp(c - m)
            et = jnp.exp(t - m)
            inv = pl.reciprocal(jnp.sum(ec, axis=-1, keepdims=True)
                                + jnp.sum(et, axis=-1, keepdims=True),
                                approx=True)
            curr_sm.append(ec * inv)
            temp_sm.append(et * inv)
        pieces = pieces + curr_sm + temp_sm
        if n_pad > n_raw:
            pieces.append(y[:, n_raw:])               # zero padding columns
        o_ref[...] = jnp.concatenate(pieces, axis=-1)
    return kernel


def pallas_fused_query_proj(x, w_bf16, b_f32, H, LPc, TLPt, off_cl, off_tl, n_raw):
    M, K = x.shape
    n_pad = w_bf16.shape[1]
    kernel = _make_fused_proj_kernel(H, LPc, TLPt, off_cl, off_tl, n_raw, n_pad)
    return pl.pallas_call(
        kernel,
        grid=(1,),
        in_specs=[pl.BlockSpec((M, K), lambda i: (0, 0)),
                  pl.BlockSpec((K, n_pad), lambda i: (0, 0)),
                  pl.BlockSpec((1, n_pad), lambda i: (0, 0))],
        out_specs=pl.BlockSpec((M, n_pad), lambda i: (0, 0)),
        out_shape=jax.ShapeDtypeStruct((M, n_pad), jnp.float32),
    )(x.astype(jnp.float32), w_bf16, b_f32.reshape(1, n_pad).astype(jnp.float32))


# ----------------------------------------------------------------------------
# Fused MSDeformAttn core: current + temporal sampling, frame add, output_proj.
# Grid over frames; temporal frames fetched via scalar-prefetched indices.
# ----------------------------------------------------------------------------
def _make_fused_deform_kernel(Lq, Len_in, C, n_heads, d_head, tw, Kc, Kt, L, Pc, Pt):
    LPc = L * Pc          # current-frame columns per head
    TLPt = tw * L * Pt    # temporal columns per head
    LPt = L * Pt          # temporal columns per (head, window-slot)

    def corners(lx, ly, aw, Wf, Hf, Wi, Hi, Si):
        # lx/ly/aw: (K, Lq); constants: (K, 1). Whole-K vectorized bilinear math.
        px = lx * Wf - 0.5
        py = ly * Hf - 0.5
        x0f = jnp.floor(px)
        y0f = jnp.floor(py)
        fx = px - x0f
        fy = py - y0f
        x0 = x0f.astype(jnp.int32)
        y0 = y0f.astype(jnp.int32)
        res = []
        for dy in (0, 1):
            wy = fy if dy else (1.0 - fy)
            yi = y0 + dy
            for dx in (0, 1):
                wx = fx if dx else (1.0 - fx)
                xi = x0 + dx
                valid = ((xi >= 0) & (xi < Wi) & (yi >= 0) & (yi < Hi))
                cw = aw * wy * wx * valid.astype(jnp.float32)   # (K, Lq)
                idx = Si + yi * Wi + xi                          # (K, Lq) int32
                res.append((idx, cw))
        return res

    def scatter(corner_list, K):
        # Weighted one-hot over source positions, summed over the 4 corners.
        pos = jax.lax.broadcasted_iota(jnp.int32, (K, Lq, Len_in), 2)
        acc = jnp.zeros((K, Lq, Len_in), jnp.float32)
        for idx, cw in corner_list:
            acc = acc + jnp.where(idx[:, :, None] == pos, cw[:, :, None], 0.0)
        return acc

    def kernel(tidx_ref, *refs):
        del tidx_ref                      # only used by the index_maps
        vcur_ref = refs[0]
        vtemp_refs = refs[1:1 + tw]
        samp_ref, cc_ref, wout_ref, bout_ref, o_ref = refs[1 + tw:]

        samp = samp_ref[...]              # (3*Kc + 3*Kt, Lq) f32
        lx_c = samp[0:Kc, :]
        ly_c = samp[Kc:2 * Kc, :]
        aw_c = samp[2 * Kc:3 * Kc, :]
        b0 = 3 * Kc
        lx_t = samp[b0:b0 + Kt, :]
        ly_t = samp[b0 + Kt:b0 + 2 * Kt, :]
        aw_t = samp[b0 + 2 * Kt:b0 + 3 * Kt, :]

        cc = cc_ref[...]                  # (Kc+Kt, 4): [W, H, within-frame start, 0]
        Wcf = cc[0:Kc, 0:1]
        Hcf = cc[0:Kc, 1:2]
        Sci = cc[0:Kc, 2:3].astype(jnp.int32)
        Wtf = cc[Kc:Kc + Kt, 0:1]
        Htf = cc[Kc:Kc + Kt, 1:2]
        Sti = cc[Kc:Kc + Kt, 2:3].astype(jnp.int32)

        W3c = scatter(corners(lx_c, ly_c, aw_c, Wcf, Hcf,
                              Wcf.astype(jnp.int32), Hcf.astype(jnp.int32), Sci), Kc)
        W3t = scatter(corners(lx_t, ly_t, aw_t, Wtf, Htf,
                              Wtf.astype(jnp.int32), Htf.astype(jnp.int32), Sti), Kt)

        vcur = vcur_ref[...]              # (Len_in, C) bf16
        vtmp = [r[...] for r in vtemp_refs]

        head_outs = []
        for h in range(n_heads):
            # current-frame contribution
            A = jnp.sum(W3c[h * LPc:(h + 1) * LPc], axis=0)       # (Lq, Len_in)
            vh = vcur[:, h * d_head:(h + 1) * d_head]
            oh = jnp.dot(A.astype(jnp.bfloat16), vh,
                         preferred_element_type=jnp.float32)
            # temporal contributions (one per window slot / prefetched frame)
            for j in range(tw):
                s0 = h * TLPt + j * LPt
                At = jnp.sum(W3t[s0:s0 + LPt], axis=0)            # (Lq, Len_in)
                oh = oh + jnp.dot(At.astype(jnp.bfloat16),
                                  vtmp[j][:, h * d_head:(h + 1) * d_head],
                                  preferred_element_type=jnp.float32)
            head_outs.append(oh)

        frame_out = jnp.concatenate(head_outs, axis=-1)           # (Lq, C) f32
        # fused output projection; single full-width store per frame
        o_ref[...] = (jnp.dot(frame_out.astype(jnp.bfloat16), wout_ref[...],
                              preferred_element_type=jnp.float32)
                      + bout_ref[...])
    return kernel


def pallas_fused_deform(value_bf16, sampT, t_idx_flat, colconst,
                        wout_bf16, bout, n_heads, n_levels, Pc, Pt, tw):
    T, Len_in, C = value_bf16.shape
    _, SW, Lq = sampT.shape
    d_head = C // n_heads
    Kc = n_heads * n_levels * Pc
    Kt = n_heads * tw * n_levels * Pt

    kernel = _make_fused_deform_kernel(Lq, Len_in, C, n_heads, d_head, tw,
                                       Kc, Kt, n_levels, Pc, Pt)

    grid_spec = pltpu.PrefetchScalarGridSpec(
        num_scalar_prefetch=1,
        grid=(T,),
        in_specs=(
            [pl.BlockSpec((None, Len_in, C), lambda t, ti: (t, 0, 0))]       # current
            + [pl.BlockSpec((None, Len_in, C),
                            (lambda t, ti, j=j: (ti[t * tw + j], 0, 0)))      # temporal
               for j in range(tw)]
            + [pl.BlockSpec((None, SW, Lq), lambda t, ti: (t, 0, 0)),         # packed samp
               pl.BlockSpec((Kc + Kt, 4), lambda t, ti: (0, 0)),              # column consts
               pl.BlockSpec((C, C), lambda t, ti: (0, 0)),                    # output_proj W
               pl.BlockSpec((1, C), lambda t, ti: (0, 0))]),                  # output_proj b
        out_specs=pl.BlockSpec((None, Lq, C), lambda t, ti: (t, 0, 0)),
    )
    return pl.pallas_call(
        kernel,
        grid_spec=grid_spec,
        out_shape=jax.ShapeDtypeStruct((T, Lq, C), jnp.float32),
        compiler_params=pltpu.CompilerParams(
            dimension_semantics=("parallel",)),
    )(t_idx_flat, value_bf16, *([value_bf16] * tw), sampT, colconst,
      wout_bf16, bout.reshape(1, C).astype(jnp.float32))


# ----------------------------------------------------------------------------
# Module (parameters + forward glue)
# ----------------------------------------------------------------------------
class TemporalMSDeformAttnDecoderPallas:

    def __init__(self, key, n_frames=3, d_model=32, n_levels=2, t_window=2,
                 n_heads=4, n_curr_points=2, n_temporal_points=2,
                 dec_instance_aware_att=True):
        assert d_model % n_heads == 0
        self.d_model = d_model
        self.n_frames = n_frames
        self.n_levels = n_levels
        self.t_window = t_window
        self.n_heads = n_heads
        self.n_curr_points = n_curr_points
        self.n_temporal_points = n_temporal_points
        self.dec_instance_aware_att = dec_instance_aware_att
        self._init_params(key)

    def _init_params(self, key):
        H, L, Pc, Pt, tw, C = (self.n_heads, self.n_levels, self.n_curr_points,
                               self.n_temporal_points, self.t_window, self.d_model)
        # mirrors _reset_parameters()
        thetas = jnp.arange(H, dtype=jnp.float32) * (2.0 * math.pi / H)
        grid_init = jnp.stack([jnp.cos(thetas), jnp.sin(thetas)], -1)       # (H, 2)
        grid_init = grid_init / jnp.max(jnp.abs(grid_init), axis=-1, keepdims=True)

        curr = jnp.tile(grid_init.reshape(H, 1, 1, 2), (1, L, Pc, 1))
        curr = curr * jnp.arange(1, Pc + 1, dtype=jnp.float32).reshape(1, 1, Pc, 1)
        self.sampling_offsets_w = jnp.zeros((C, H * L * Pc * 2), jnp.float32)
        self.sampling_offsets_b = curr.reshape(-1)

        temporal = jnp.tile(grid_init.reshape(H, 1, 1, 1, 2), (1, L, tw, Pt, 1))
        temporal = temporal * jnp.arange(1, Pt + 1, dtype=jnp.float32).reshape(1, 1, 1, Pt, 1)
        self.temporal_sampling_offsets_w = jnp.zeros((C, H * L * tw * Pt * 2), jnp.float32)
        self.temporal_sampling_offsets_b = temporal.reshape(-1)

        self.attention_weights_w = jnp.zeros((C, H * L * Pc), jnp.float32)
        self.attention_weights_b = jnp.zeros((H * L * Pc,), jnp.float32)
        self.temporal_attention_weights_w = jnp.zeros((C, H * L * tw * Pt), jnp.float32)
        self.temporal_attention_weights_b = jnp.zeros((H * L * tw * Pt,), jnp.float32)

        k1, k2 = jax.random.split(key)
        a = math.sqrt(6.0 / (C + C))  # xavier_uniform
        self.value_proj_w = jax.random.uniform(k1, (C, C), jnp.float32, -a, a)
        self.value_proj_b = jnp.zeros((C,), jnp.float32)
        self.output_proj_w = jax.random.uniform(k2, (C, C), jnp.float32, -a, a)
        self.output_proj_b = jnp.zeros((C,), jnp.float32)

        # --- fused query-side projection (one matmul, lane-dense padded output) ---
        co_w = H * L * Pc * 2
        to_w = H * L * tw * Pt * 2
        cl_w = H * L * Pc
        tl_w = H * L * tw * Pt
        self._off_co = 0
        self._off_to = co_w
        self._off_cl = co_w + to_w
        self._off_tl = co_w + to_w + cl_w
        self._n_raw = co_w + to_w + cl_w + tl_w
        self._n_pad = max(128, ((self._n_raw + 127) // 128) * 128)
        w_f = jnp.concatenate([self.sampling_offsets_w,
                               self.temporal_sampling_offsets_w,
                               self.attention_weights_w,
                               self.temporal_attention_weights_w], axis=1)
        b_f = jnp.concatenate([self.sampling_offsets_b,
                               self.temporal_sampling_offsets_b,
                               self.attention_weights_b,
                               self.temporal_attention_weights_b])
        pad = self._n_pad - self._n_raw
        if pad:
            w_f = jnp.pad(w_f, ((0, 0), (0, pad)))
            b_f = jnp.pad(b_f, ((0, pad),))
        self._w_fused_bf16 = w_f.astype(jnp.bfloat16)
        self._b_fused = b_f.astype(jnp.float32)
        self._wout_bf16 = self.output_proj_w.astype(jnp.bfloat16)

    # per-sampled-column (W, H, within-frame start) constants, packed for the kernel
    def _build_colconst(self, curr_shapes, curr_start, temporal_shapes,
                        temporal_start, Len_in):
        H, L, Pc, Pt, tw = (self.n_heads, self.n_levels, self.n_curr_points,
                            self.n_temporal_points, self.t_window)
        rows = []
        for k in range(H * L * Pc):
            l = (k // Pc) % L
            hl, wl = curr_shapes[l]
            rows.append((float(wl), float(hl), float(curr_start[l]), 0.0))
        for k in range(H * tw * L * Pt):
            m = (k // Pt) % (tw * L)
            hl, wl = temporal_shapes[m]
            j = m // L                    # window slot (frame-major temporal flatten)
            within = temporal_start[m] - j * Len_in
            rows.append((float(wl), float(hl), float(within), 0.0))
        return jnp.asarray(np.asarray(rows, np.float32))

    def __call__(self, query, reference_points, input_flatten,
                 input_spatial_shapes, input_level_start_index, temporal_offsets):
        H, L, Pc, Pt, tw, C = (self.n_heads, self.n_levels, self.n_curr_points,
                               self.n_temporal_points, self.t_window, self.d_model)

        curr_shapes_in, temporal_shapes_in = input_spatial_shapes
        curr_start_in, temporal_start_in = input_level_start_index
        curr_shapes = [(int(h), int(w)) for h, w in np.asarray(curr_shapes_in)]
        temporal_shapes = [(int(h), int(w)) for h, w in np.asarray(temporal_shapes_in)]
        curr_start = [int(s) for s in np.asarray(curr_start_in)]
        temporal_start = [int(s) for s in np.asarray(temporal_start_in)]

        T_ = input_flatten.shape[0]
        embd_per_frame = query.shape[1] // T_
        query = query.reshape(T_, embd_per_frame, query.shape[-1])
        if reference_points.shape[0] != T_:
            reference_points = reference_points.reshape(
                (T_, embd_per_frame) + reference_points.shape[-2:])
        Lq = embd_per_frame
        Len_in = input_flatten.shape[1]
        Kc = H * L * Pc
        Kt = H * tw * L * Pt

        # ---- value projection (Pallas, M-tiled, bf16 output for the deform core) ----
        value = pallas_linear(input_flatten.reshape(T_ * Len_in, C),
                              self.value_proj_w, self.value_proj_b,
                              out_dtype=jnp.bfloat16).reshape(T_, Len_in, C)

        # ---- fused query-side projections + softmax (one Pallas call) ----
        q2d = query.reshape(T_ * Lq, C)
        y = pallas_fused_query_proj(q2d, self._w_fused_bf16, self._b_fused,
                                    H, L * Pc, tw * L * Pt,
                                    self._off_cl, self._off_tl, self._n_raw)
        curr_off = y[:, self._off_co:self._off_co + 2 * Kc].reshape(T_, Lq, H, L, Pc, 2)
        t_off = y[:, self._off_to:self._off_to + 2 * Kt].reshape(
            T_, Lq, H, tw, L, Pt, 2).reshape(T_, Lq, H, tw * L, Pt, 2)
        aw_curr = y[:, self._off_cl:self._off_cl + Kc].reshape(T_, Lq, H, L, Pc)
        aw_temp = y[:, self._off_tl:self._off_tl + Kt].reshape(T_, Lq, H, tw * L, Pt)

        # ---- sampling locations (broadcast glue, tiny) ----
        curr_shapes_f = jnp.asarray(curr_shapes, jnp.float32)               # (L, 2) as (H, W)
        offset_normalizer = jnp.stack([curr_shapes_f[:, 1], curr_shapes_f[:, 0]], -1)
        temporal_normalizer = jnp.tile(offset_normalizer, (tw, 1))          # (tw*L, 2)

        t_idx = temporal_offsets + jnp.arange(T_, dtype=temporal_offsets.dtype)[:, None]
        try:  # bounds check when indices are concrete (JAX would silently clamp)
            ti_np = np.asarray(t_idx)
            if ti_np.min() < 0 or ti_np.max() >= T_:
                raise ValueError("temporal_offsets produce out-of-range frame indices")
        except Exception:
            pass

        if self.dec_instance_aware_att:
            t_ref = reference_points[t_idx]                                  # (T, tw, Lq, L, d)
            t_ref = jnp.transpose(t_ref, (0, 2, 1, 3, 4)).reshape(
                T_, Lq, tw * L, reference_points.shape[-1])
        else:
            t_ref = jnp.tile(reference_points, (1, 1, tw, 1)).reshape(
                T_, Lq, tw * L, reference_points.shape[-1])

        if reference_points.shape[-1] == 2:
            curr_loc = (reference_points[:, :, None, :, None, :] +
                        curr_off / offset_normalizer[None, None, None, :, None, :])
            t_loc = (t_ref[:, :, None, :, None, :] +
                     t_off / temporal_normalizer[None, None, None, :, None, :])
        elif reference_points.shape[-1] == 4:
            curr_loc = (reference_points[:, :, None, :, None, :2] +
                        curr_off / Pc * reference_points[:, :, None, :, None, 2:] * 0.5)
            t_loc = (t_ref[:, :, None, :, None, :2] +
                     t_off / Pt * t_ref[:, :, None, :, None, 2:] * 0.5)
        else:
            raise ValueError("Last dim of reference_points must be 2 or 4.")

        # ---- pack sampling operands as (T, 3*(Kc+Kt), Lq): one DMA per frame ----
        samp = jnp.concatenate([
            curr_loc[..., 0].reshape(T_, Lq, Kc),
            curr_loc[..., 1].reshape(T_, Lq, Kc),
            aw_curr.reshape(T_, Lq, Kc),
            t_loc[..., 0].reshape(T_, Lq, Kt),
            t_loc[..., 1].reshape(T_, Lq, Kt),
            aw_temp.reshape(T_, Lq, Kt)], axis=-1)
        sampT = jnp.transpose(samp, (0, 2, 1)).astype(jnp.float32)          # (T, 144, Lq)

        colconst = self._build_colconst(curr_shapes, curr_start,
                                        temporal_shapes, temporal_start, Len_in)

        # ---- fused deformable attention core (+ frame add + output_proj) ----
        out = pallas_fused_deform(value, sampT,
                                  jnp.asarray(t_idx, jnp.int32).reshape(-1),
                                  colconst, self._wout_bf16, self.output_proj_b,
                                  H, L, Pc, Pt, tw)
        output = out.reshape(1, T_ * Lq, C)

        curr_locs_list = [curr_loc[t][None] for t in range(T_)]
        temp_locs_list = [t_loc[t][None] for t in range(T_)]
        return output, curr_locs_list, temp_locs_list, aw_curr, aw_temp


# ----------------------------------------------------------------------------
if __name__ == "__main__":
    key = jax.random.PRNGKey(0)
    T_, Lq, d_model = 3, 8, 32
    n_levels, t_window, n_heads = 2, 2, 4
    n_curr_points, n_temporal_points = 2, 2

    spatial_shapes = [(8, 8), (4, 4)]
    Len_in = sum(h * w for h, w in spatial_shapes)          # 80
    curr_start = [0]
    for h, w in spatial_shapes[:-1]:
        curr_start.append(curr_start[-1] + h * w)
    temporal_shapes = spatial_shapes * t_window
    temporal_start = [0]
    for h, w in temporal_shapes[:-1]:
        temporal_start.append(temporal_start[-1] + h * w)

    k1, k2, k3, kparam = jax.random.split(key, 4)
    query = jax.random.normal(k1, (1, T_ * Lq, d_model), jnp.float32)
    input_flatten = jax.random.normal(k2, (T_, Len_in, d_model), jnp.float32)
    reference_points = jax.random.uniform(k3, (T_, Lq, n_levels, 2),
                                          jnp.float32, minval=0.1, maxval=0.9)
    # per-frame temporal frame offsets (so that t + offset stays in [0, T_-1])
    temporal_offsets = jnp.array([[1, 2], [-1, 1], [-2, -1]], jnp.int32)

    model = TemporalMSDeformAttnDecoderPallas(
        kparam, n_frames=T_, d_model=d_model, n_levels=n_levels,
        t_window=t_window, n_heads=n_heads, n_curr_points=n_curr_points,
        n_temporal_points=n_temporal_points, dec_instance_aware_att=True)

    out, curr_locs, temp_locs, aw_curr, aw_temp = model(
        query, reference_points, input_flatten,
        (spatial_shapes, temporal_shapes),
        (curr_start, temporal_start),
        temporal_offsets)

    jax.block_until_ready(out)
    assert out.shape == (1, T_ * Lq, d_model)
    assert curr_locs[0].shape == (1, Lq, n_heads, n_levels, n_curr_points, 2)
    assert temp_locs[0].shape == (1, Lq, n_heads, t_window * n_levels, n_temporal_points, 2)
    assert aw_curr.shape == (T_, Lq, n_heads, n_levels, n_curr_points)
    assert aw_temp.shape == (T_, Lq, n_heads, t_window * n_levels, n_temporal_points)
    print("KERNEL_OK")
</pallas_src>

<mosaic_0001>
module attributes {stable_mosaic.version = 11 : i64} {
  func.func @_linear_kernel(%arg0: i32, %arg1: memref<120x32xf32, #tpu.memory_space<vmem>>, %arg2: memref<32x32xbf16, #tpu.memory_space<vmem>>, %arg3: memref<1x32xf32, #tpu.memory_space<vmem>>, %arg4: memref<120x32xbf16, #tpu.memory_space<vmem>>) attributes {dimension_semantics = [#tpu.dimension_semantics<parallel>], iteration_bounds = array<i64: 2>, scalar_prefetch = 0 : i64, scratch_operands = 0 : i64, tpu.core_type = #tpu.core_type<tc>, window_params = [{transform_indices = @transform_0, window_bounds = array<i64: 120, 32>}, {pipeline_mode = #tpu.pipeline_mode<synchronous>, transform_indices = @transform_1, window_bounds = array<i64: 32, 32>}, {pipeline_mode = #tpu.pipeline_mode<synchronous>, transform_indices = @transform_2, window_bounds = array<i64: 1, 32>}, {transform_indices = @transform_3, window_bounds = array<i64: 120, 32>}]} {
    %c0 = arith.constant 0 : index
    %c0_0 = arith.constant 0 : index
    %0 = vector.load %arg1[%c0, %c0_0] : memref<120x32xf32, #tpu.memory_space<vmem>>, vector<120x32xf32>
    %1 = arith.truncf %0 : vector<120x32xf32> to vector<120x32xbf16>
    %c0_1 = arith.constant 0 : index
    %c0_2 = arith.constant 0 : index
    %2 = vector.load %arg2[%c0_1, %c0_2] : memref<32x32xbf16, #tpu.memory_space<vmem>>, vector<32x32xbf16>
    %cst = arith.constant dense<0.000000e+00> : vector<120x32xf32>
    %3 = tpu.matmul %1, %2, %cst {dimension_numbers = #tpu.dot_dimension_numbers<[1], [0], [0], [1], [0, 0, 1, 1], [], []>} : vector<120x32xbf16>, vector<32x32xbf16>, vector<120x32xf32> -> vector<120x32xf32>
    %c0_3 = arith.constant 0 : index
    %c0_4 = arith.constant 0 : index
    %4 = vector.load %arg3[%c0_3, %c0_4] : memref<1x32xf32, #tpu.memory_space<vmem>>, vector<1x32xf32>
    %5 = vector.broadcast %4 : vector<1x32xf32> to vector<120x32xf32>
    %6 = arith.addf %3, %5 : vector<120x32xf32>
    %7 = arith.truncf %6 : vector<120x32xf32> to vector<120x32xbf16>
    %c0_5 = arith.constant 0 : index
    %c0_6 = arith.constant 0 : index
    %8 = vector.load %arg4[%c0_5, %c0_6] : memref<120x32xbf16, #tpu.memory_space<vmem>>, vector<120x32xbf16>
    tpu.vector_store %arg4[%c0_5, %c0_6], %7 {strides = array<i32>} : memref<120x32xbf16, #tpu.memory_space<vmem>>, vector<120x32xbf16>,
    return
  }
  func.func @transform_0(%arg0: i32) -> (i32, i32) {
    %c0_i32 = arith.constant 0 : i32
    %c0_i32_0 = arith.constant 0 : i32
    return %arg0, %c0_i32 : i32, i32
  }
  func.func @transform_1(%arg0: i32) -> (i32, i32) {
    %c0_i32 = arith.constant 0 : i32
    %c0_i32_0 = arith.constant 0 : i32
    %c0_i32_1 = arith.constant 0 : i32
    return %c0_i32, %c0_i32_0 : i32, i32
  }
  func.func @transform_2(%arg0: i32) -> (i32, i32) {
    %c0_i32 = arith.constant 0 : i32
    %c0_i32_0 = arith.constant 0 : i32
    %c0_i32_1 = arith.constant 0 : i32
    return %c0_i32, %c0_i32_0 : i32, i32
  }
  func.func @transform_3(%arg0: i32) -> (i32, i32) {
    %c0_i32 = arith.constant 0 : i32
    %c0_i32_0 = arith.constant 0 : i32
    return %arg0, %c0_i32 : i32, i32
  }
}

</mosaic_0001>

<bundles_post_ra>
// kernel: tpu_custom_call.1
= control target key start
LH: loop header
LB: loop body
LE: loop exit
PB: predicated region body
PF: predicated region fallthrough
CT: control target
= control target key end

     0   :  { %s448_s12 = smov 0   ;;  %s518_s0 = inlined_call_operand.vmem [shape: f32[240,32], index: 0, kind: input, shape index: {}]   ;;  %s519_s1 = inlined_call_operand.vmem [shape: bf16[32,32], index: 1, kind: input, shape index: {}]   ;;  %s520_s2 = inlined_call_operand.vmem [shape: f32[1,32], index: 2, kind: input, shape index: {}]   ;;  %s521_s3 = inlined_call_operand.vmem [shape: bf16[240,32], index: 3, kind: output, shape index: {}]  }
   0x1 LB: > { %s378_s13 = sadd.s32 4294967295, %s426_s12   ;;  %p382_p0 = scmp.ge.s32.totalorder %s426_s12, 1  ;;  %s426_s12 = sphi %s448_s12, %s13_s12  }
   0x2   : > { %p138_p1 = scmp.lt.s32.totalorder %s426_s12, 3 }
   0x4   : > { %p139_p2 = pnand %p382_p0, %p138_p1 }
   0x5   : > { %s162_s16 = smul.u32 (!%p139_p2), 15, %s378_s13 }
   0x6   : > { %142 = sbr.rel (%p139_p2) target bundleno = 181 (0xb5), region = 32 }
   0x7   : > { %p163_p3 = scmp.lt.s32.totalorder (!%p139_p2), %s162_s16, 29 }
   0xb   : > { %v404_v0 = vld [vmem:[%s519_s1 + $0x8] sm:$0xff]  ;;  %v403_v1 = vld [vmem:[%s519_s1] sm:$0xff]  ;;  %s523_s16 = smov (!%p163_p3, %s162_s16), 29  ;;  %vm218_vm0 = vcmask 261120   ;;  %vm306_vm1 = vcmask 257024  }
   0xc   : > { %249 = vmatpush.bf16.msra.mxu0 %v404_v0  ;;  %405 = vmatpush.bf16.msra.mxu1 %v404_v0  ;;  %s383_s19 = sshll.u32 %s523_s16, 3  ;;  %v419_v25 = vld [vmem:[%s520_s2] ss:$0 sm:$0xff]  ;;  %s384_s25 = sshll.u32 %s523_s16, 2 }
   0xd   : > { %406 = vmatpush.bf16.msra.mxu2 %v404_v0  ;;  %407 = vmatpush.bf16.msra.mxu3 %v404_v0  ;;  %s166_s22 = scalar_lea.vmem %s518_s0, %s383_s19  ;;  %s483_s28 = scalar_lea.vmem %s521_s3, %s384_s25 }
   0xe   : > { %v175_v2 = vld [vmem:[%s166_s22] sm:$0xff]  ;;  %v176_v3 = vld [vmem:[%s166_s22 + $0x8] sm:$0xff]  ;;  %v177_v14 = vld [vmem:[%s166_s22 + $0x10] sm:$0xff] }
   0xf   : > { %v179_v4 = vld [vmem:[%s166_s22 + $0x20] sm:$0xff]  ;;  %v190_v5 = vpack.c.bf16 %v176_v3, %v175_v2  ;;  %v180_v6 = vld [vmem:[%s166_s22 + $0x28] sm:$0xff]  ;;  %v178_v15 = vld [vmem:[%s166_s22 + $0x18] sm:$0xff] }
  0x10   : > { %250 = vmatpush.bf16.msra.mxu0 %v403_v1  ;;  %408 = vmatpush.bf16.msra.mxu1 %v403_v1  ;;  %v183_v7 = vld [vmem:[%s166_s22 + $0x40] sm:$0xff]  ;;  %v184_v8 = vld [vmem:[%s166_s22 + $0x48] sm:$0xff]  ;;  %v192_v9 = vpack.c.bf16 %v180_v6, %v179_v4  ;;  %v181_v16 = vld [vmem:[%s166_s22 + $0x30] sm:$0xff]  ;;  %v191_v21 = vpack.c.bf16 %v178_v15, %v177_v14 }
  0x11   : > { %409 = vmatpush.bf16.msra.mxu2 %v403_v1  ;;  %410 = vmatpush.bf16.msra.mxu3 %v403_v1  ;;  %v194_v10 = vpack.c.bf16 %v184_v8, %v183_v7  ;;  %v187_v11 = vld [vmem:[%s166_s22 + $0x60] sm:$0xff]  ;;  %v188_v12 = vld [vmem:[%s166_s22 + $0x68] sm:$0xff]  ;;  %v182_v17 = vld [vmem:[%s166_s22 + $0x38] sm:$0xff] }
  0x12   : > { %v196_v13 = vpack.c.bf16 %v188_v12, %v187_v11  ;;  %v185_v18 = vld [vmem:[%s166_s22 + $0x50] sm:$0xff]  ;;  %v186_v19 = vld [vmem:[%s166_s22 + $0x58] sm:$0xff]  ;;  %v193_v22 = vpack.c.bf16 %v182_v17, %v181_v16 }
  0x13   : > { %393 = vmatmul.msk.bf16.vlgmr.msra.gmra.mxu0 %vm218_vm0, %v190_v5  ;;  %395 = vmatmul.msk.bf16.vlgmr.msra.gmra.mxu1 %vm218_vm0, %v192_v9  ;;  %v189_v20 = vld [vmem:[%s166_s22 + $0x70] sm:$0xff]  ;;  %v195_v23 = vpack.c.bf16 %v186_v19, %v185_v18 }
  0x14   : > { %397 = vmatmul.msk.bf16.vlgmr.msra.gmra.mxu2 %vm218_vm0, %v194_v10  ;;  %399 = vmatmul.msk.bf16.vlgmr.msra.gmra.mxu3 %vm218_vm0, %v196_v13  ;;  %v197_v24 = vpack.c.bf16 %v189_v20, %v189_v20 }
  0x23   : > { %394 = vmatmul.msk.bf16.gmra.mxu0 %vm218_vm0, %v191_v21  ;;  %396 = vmatmul.msk.bf16.gmra.mxu1 %vm218_vm0, %v193_v22 }
  0x24   : > { %398 = vmatmul.msk.bf16.gmra.mxu2 %vm218_vm0, %v195_v23  ;;  %400 = vmatmul.msk.bf16.gmra.mxu3 %vm218_vm0, %v197_v24 }
  0x90   : > { %v252_v26 = vpop.f32.mrf.mxu0  ;;  %v262_v28 = vpop.f32.mrf.mxu1 }
  0x91   : > { %v253_v27 = vadd.f32 %v419_v25, %v252_v26  ;;  %v263_v29 = vadd.f32 %v419_v25, %v262_v28 }
  0x93   : > { %v291_v30 = vpack.c.bf16 %v253_v27, %v253_v27  ;;  %v295_v31 = vpack.c.bf16 %v263_v29, %v263_v29 }
  0x95   : > { %307 = vst.msk [vmem:[%s483_s28] sm:$0xf] %vm306_vm1, %v291_v30 }
  0x96   : > { %311 = vst.msk [vmem:[%s483_s28 + $0x10] sm:$0xf] %vm306_vm1, %v295_v31 }
  0x97   : > { %v272_v32 = vpop.f32.mrf.mxu2  ;;  %v282_v34 = vpop.f32.mrf.mxu3 }
  0x98   : > { %v273_v33 = vadd.f32 %v419_v25, %v272_v32  ;;  %v254_v35 = vpop.f32.mrf.mxu0  ;;  %v283_v36 = vadd.f32 %v419_v25, %v282_v34  ;;  %v264_v38 = vpop.f32.mrf.mxu1 }
  0x99   : > { %v255_v37 = vadd.f32 %v419_v25, %v254_v35  ;;  %v265_v40 = vadd.f32 %v419_v25, %v264_v38 }
  0x9a   : > { %v299_v39 = vpack.c.bf16 %v273_v33, %v273_v33  ;;  %v303_v41 = vpack.c.bf16 %v283_v36, %v283_v36 }
  0x9b   : > { %v292_v42 = vpack.c.bf16 %v255_v37, %v255_v37  ;;  %v296_v43 = vpack.c.bf16 %v265_v40, %v265_v40 }
  0x9c   : > { %315 = vst.msk [vmem:[%s483_s28 + $0x20] sm:$0xf] %vm306_vm1, %v299_v39 }
  0x9d   : > { %319 = vst.msk [vmem:[%s483_s28 + $0x30] sm:$0xf] %vm306_vm1, %v303_v41 }
  0x9e   : > { %308 = vst.msk [vmem:[%s483_s28 + $0x4] sm:$0xf] %vm306_vm1, %v292_v42 }
  0x9f   : > { %312 = vst.msk [vmem:[%s483_s28 + $0x14] sm:$0xf] %vm306_vm1, %v296_v43  ;;  %v274_v44 = vpop.f32.mrf.mxu2  ;;  %v284_v46 = vpop.f32.mrf.mxu3 }
  0xa0   : > { %v275_v45 = vadd.f32 %v419_v25, %v274_v44  ;;  %v257_v47 = vpop.f32.mrf.mxu0  ;;  %v285_v48 = vadd.f32 %v419_v25, %v284_v46  ;;  %v267_v50 = vpop.f32.mrf.mxu1 }
  0xa1   : > { %v258_v49 = vadd.f32 %v419_v25, %v257_v47  ;;  %v268_v52 = vadd.f32 %v419_v25, %v267_v50 }
  0xa2   : > { %v300_v51 = vpack.c.bf16 %v275_v45, %v275_v45  ;;  %v304_v53 = vpack.c.bf16 %v285_v48, %v285_v48 }
  0xa3   : > { %v293_v54 = vpack.c.bf16 %v258_v49, %v258_v49  ;;  %v297_v55 = vpack.c.bf16 %v268_v52, %v268_v52 }
  0xa4   : > { %316 = vst.msk [vmem:[%s483_s28 + $0x24] sm:$0xf] %vm306_vm1, %v300_v51 }
  0xa5   : > { %320 = vst.msk [vmem:[%s483_s28 + $0x34] sm:$0xf] %vm306_vm1, %v304_v53 }
  0xa6   : > { %309 = vst.msk [vmem:[%s483_s28 + $0x8] sm:$0xf] %vm306_vm1, %v293_v54 }
  0xa7   : > { %313 = vst.msk [vmem:[%s483_s28 + $0x18] sm:$0xf] %vm306_vm1, %v297_v55  ;;  %v277_v56 = vpop.f32.mrf.mxu2  ;;  %v287_v58 = vpop.f32.mrf.mxu3 }
  0xa8   : > { %v278_v57 = vadd.f32 %v419_v25, %v277_v56  ;;  %v259_v59 = vpop.f32.mrf.mxu0  ;;  %v288_v60 = vadd.f32 %v419_v25, %v287_v58  ;;  %v269_v62 = vpop.f32.mrf.mxu1 }
  0xa9   : > { %v260_v61 = vadd.f32 %v419_v25, %v259_v59  ;;  %v270_v0 = vadd.f32 %v419_v25, %v269_v62 }
  0xaa   : > { %v301_v63 = vpack.c.bf16 %v278_v57, %v278_v57  ;;  %v305_v1 = vpack.c.bf16 %v288_v60, %v288_v60 }
  0xab   : > { %v294_v2 = vpack.c.bf16 %v260_v61, %v260_v61  ;;  %v298_v3 = vpack.c.bf16 %v270_v0, %v270_v0 }
  0xac   : > { %317 = vst.msk [vmem:[%s483_s28 + $0x28] sm:$0xf] %vm306_vm1, %v301_v63 }
  0xad   : > { %321 = vst.msk [vmem:[%s483_s28 + $0x38] sm:$0xf] %vm306_vm1, %v305_v1 }
  0xae   : > { %310 = vst.msk [vmem:[%s483_s28 + $0xc] sm:$0xf] %vm306_vm1, %v294_v2 }
  0xaf   : > { %314 = vst.msk [vmem:[%s483_s28 + $0x1c] sm:$0xf] %vm306_vm1, %v298_v3  ;;  %v279_v4 = vpop.f32.mrf.mxu2  ;;  %v289_v6 = vpop.f32.mrf.mxu3 }
  0xb0   : > { %v280_v5 = vadd.f32 %v419_v25, %v279_v4 }
  0xb2   : > { %v302_v7 = vpack.c.bf16 %v280_v5, %v280_v5 }
  0xb4   : > { %318 = vst.msk [vmem:[%s483_s28 + $0x2c] sm:$0xf] %vm306_vm1, %v302_v7 }
  0xb5 PF: > { %s13_s12 = sadd.s32 1, %s426_s12  }
  0xb6   : > { %p10_p4 = scmp.ge.s32.totalorder %s13_s12, 4  }
  0xb8   :  { %12 = sbr.rel (!%p10_p4) target bundleno = 1 (0x1), region = 62 }

</bundles_post_ra>
